<compile_context>
chip_gen: v7x
topology: tpu7x:2x2x1
jax: 0.10.0
libtpu: 0.0.40
codegen_flags: <defaults>
</compile_context>

<pallas_src>
import jax
import jax.numpy as jnp
from jax.experimental import pallas as pl
from jax.experimental.pallas import tpu as pltpu


def _round_up(n, m):
    return ((n + m - 1) // m) * m


def policy_kernel(x_ref, w1_ref, b1_ref, w2_ref, b2_ref, out_ref):
    # x_ref : (state_num, TB)   batch on the lane axis
    # w1_ref: (hidden, state_num), b1_ref: (hidden, 1)
    # w2_ref: (action_num, hidden), b2_ref: (action_num, 1)
    x = x_ref[...]

    # Hidden layer: W1 @ x + b1, ReLU (MXU matmul, f32 accumulation).
    h = jnp.dot(w1_ref[...], x, preferred_element_type=jnp.float32) + b1_ref[...]
    h = jnp.maximum(h, 0.0)

    # Output layer: W2 @ h + b2.
    logits = jnp.dot(w2_ref[...], h, preferred_element_type=jnp.float32) + b2_ref[...]

    # Numerically-stable softmax over the action axis (axis 0 in this layout).
    m = jnp.max(logits, axis=0, keepdims=True)
    e = jnp.exp(logits - m)
    denom = jnp.sum(e, axis=0, keepdims=True)
    inv = pl.reciprocal(denom, approx=True)        # EUP slot (otherwise idle)
    inv = inv * (2.0 - denom * inv)                # one Newton step -> ~f32 accuracy
    out_ref[...] = (e * inv).astype(out_ref.dtype)


def discrete_policy_net(x, w1, b1, w2, b2, *, block_b=512, param_dtype=jnp.float32):
    """Forward pass of DiscretePolicyNet via a batch-gridded Pallas kernel.

    x  : [B, state_num]        float32
    w1 : [32, state_num]       float32  (PyTorch nn.Linear weight orientation)
    b1 : [32]                  float32
    w2 : [action_num, 32]      float32
    b2 : [action_num]          float32
    returns policy : [B, action_num] float32 (rows sum to 1)
    """
    B, state_num = x.shape
    hidden = w1.shape[0]
    action_num = w2.shape[0]

    # Lane-dense batch tile: multiple of 128, capped at block_b.
    TB = _round_up(min(block_b, _round_up(max(B, 1), 128)), 128)
    B_pad = _round_up(B, TB)
    grid_b = B_pad // TB

    # Present x transposed (batch on lanes), zero-padded to B_pad columns.
    xT = jnp.pad(x.T, ((0, 0), (0, B_pad - B))).astype(param_dtype)
    w1c = w1.astype(param_dtype)
    w2c = w2.astype(param_dtype)
    b1c = b1.reshape(hidden, 1).astype(jnp.float32)
    b2c = b2.reshape(action_num, 1).astype(jnp.float32)

    outT = pl.pallas_call(
        policy_kernel,
        out_shape=jax.ShapeDtypeStruct((action_num, B_pad), jnp.float32),
        grid=(grid_b,),
        in_specs=[
            pl.BlockSpec((state_num, TB), lambda i: (0, i)),      # x tile (pipelined)
            pl.BlockSpec((hidden, state_num), lambda i: (0, 0)),  # W1 (resident)
            pl.BlockSpec((hidden, 1), lambda i: (0, 0)),          # b1
            pl.BlockSpec((action_num, hidden), lambda i: (0, 0)), # W2
            pl.BlockSpec((action_num, 1), lambda i: (0, 0)),      # b2
        ],
        out_specs=pl.BlockSpec((action_num, TB), lambda i: (0, i)),
        compiler_params=pltpu.CompilerParams(
            dimension_semantics=("parallel",),   # shard batch tiles across TCs (v7x)
        ),
    )(xT, w1c, b1c, w2c, b2c)

    return outT[:, :B].T


def init_params(key, state_num, hidden, action_num):
    """PyTorch nn.Linear default init (U[-1/sqrt(fan_in), 1/sqrt(fan_in)]), native [out, in] layout."""
    k1, k2, k3, k4 = jax.random.split(key, 4)
    bound1 = 1.0 / jnp.sqrt(state_num)
    bound2 = 1.0 / jnp.sqrt(hidden)
    w1 = jax.random.uniform(k1, (hidden, state_num), jnp.float32, -bound1, bound1)
    b1 = jax.random.uniform(k2, (hidden,), jnp.float32, -bound1, bound1)
    w2 = jax.random.uniform(k3, (action_num, hidden), jnp.float32, -bound2, bound2)
    b2 = jax.random.uniform(k4, (action_num,), jnp.float32, -bound2, bound2)
    return w1, b1, w2, b2


if __name__ == "__main__":
    key = jax.random.PRNGKey(0)
    batch, state_num, hidden, action_num = 2, 8, 32, 4

    kx, kp = jax.random.split(key)
    x = jax.random.normal(kx, (batch, state_num), jnp.float32)
    w1, b1, w2, b2 = init_params(kp, state_num, hidden, action_num)

    def ref(xv):
        h = jnp.maximum(xv @ w1.T + b1, 0.0)
        return jax.nn.softmax(h @ w2.T + b2, axis=-1)

    # Small (original-spec) batch.
    policy = discrete_policy_net(x, w1, b1, w2, b2)
    jax.block_until_ready(policy)
    assert policy.shape == (batch, action_num)
    assert jnp.allclose(policy, ref(x), atol=1e-5), "mismatch vs reference (small batch)"
    assert jnp.allclose(jnp.sum(policy, axis=-1), 1.0, atol=1e-5)

    # Larger ragged batch exercising the multi-step grid + padding path.
    xb = jax.random.normal(jax.random.PRNGKey(1), (300, state_num), jnp.float32)
    policy_b = discrete_policy_net(xb, w1, b1, w2, b2, block_b=128)
    jax.block_until_ready(policy_b)
    assert policy_b.shape == (300, action_num)
    assert jnp.allclose(policy_b, ref(xb), atol=1e-5), "mismatch vs reference (tiled batch)"
    assert jnp.allclose(jnp.sum(policy_b, axis=-1), 1.0, atol=1e-5)

    print("KERNEL_OK")
</pallas_src>

<mosaic_0001>
module attributes {stable_mosaic.version = 11 : i64} {
  func.func @policy_kernel(%arg0: i32, %arg1: memref<8x128xf32, #tpu.memory_space<vmem>>, %arg2: memref<32x8xf32, #tpu.memory_space<vmem>>, %arg3: memref<32x1xf32, #tpu.memory_space<vmem>>, %arg4: memref<4x32xf32, #tpu.memory_space<vmem>>, %arg5: memref<4x1xf32, #tpu.memory_space<vmem>>, %arg6: memref<4x128xf32, #tpu.memory_space<vmem>>) attributes {dimension_semantics = [#tpu.dimension_semantics<parallel>], iteration_bounds = array<i64: 1>, scalar_prefetch = 0 : i64, scratch_operands = 0 : i64, tpu.core_type = #tpu.core_type<tc>, window_params = [{transform_indices = @transform_0, window_bounds = array<i64: 8, 128>}, {pipeline_mode = #tpu.pipeline_mode<synchronous>, transform_indices = @transform_1, window_bounds = array<i64: 32, 8>}, {pipeline_mode = #tpu.pipeline_mode<synchronous>, transform_indices = @transform_2, window_bounds = array<i64: 32, 1>}, {pipeline_mode = #tpu.pipeline_mode<synchronous>, transform_indices = @transform_3, window_bounds = array<i64: 4, 32>}, {pipeline_mode = #tpu.pipeline_mode<synchronous>, transform_indices = @transform_4, window_bounds = array<i64: 4, 1>}, {transform_indices = @transform_5, window_bounds = array<i64: 4, 128>}]} {
    %c0 = arith.constant 0 : index
    %c0_0 = arith.constant 0 : index
    %0 = vector.load %arg1[%c0, %c0_0] : memref<8x128xf32, #tpu.memory_space<vmem>>, vector<8x128xf32>
    %c0_1 = arith.constant 0 : index
    %c0_2 = arith.constant 0 : index
    %1 = vector.load %arg2[%c0_1, %c0_2] : memref<32x8xf32, #tpu.memory_space<vmem>>, vector<32x8xf32>
    %cst = arith.constant dense<0.000000e+00> : vector<32x128xf32>
    %2 = tpu.matmul %1, %0, %cst {dimension_numbers = #tpu.dot_dimension_numbers<[1], [0], [0], [1], [0, 0, 1, 1], [], []>} : vector<32x8xf32>, vector<8x128xf32>, vector<32x128xf32> -> vector<32x128xf32>
    %c0_3 = arith.constant 0 : index
    %c0_4 = arith.constant 0 : index
    %3 = vector.load %arg3[%c0_3, %c0_4] : memref<32x1xf32, #tpu.memory_space<vmem>>, vector<32x1xf32>
    %4 = vector.broadcast %3 : vector<32x1xf32> to vector<32x128xf32>
    %5 = arith.addf %2, %4 : vector<32x128xf32>
    %cst_5 = arith.constant 0.000000e+00 : f32
    %6 = vector.broadcast %cst_5 : f32 to vector<32x128xf32>
    %7 = arith.maximumf %5, %6 : vector<32x128xf32>
    %c0_6 = arith.constant 0 : index
    %c0_7 = arith.constant 0 : index
    %8 = vector.load %arg4[%c0_6, %c0_7] : memref<4x32xf32, #tpu.memory_space<vmem>>, vector<4x32xf32>
    %cst_8 = arith.constant dense<0.000000e+00> : vector<4x128xf32>
    %9 = tpu.matmul %8, %7, %cst_8 {dimension_numbers = #tpu.dot_dimension_numbers<[1], [0], [0], [1], [0, 0, 1, 1], [], []>} : vector<4x32xf32>, vector<32x128xf32>, vector<4x128xf32> -> vector<4x128xf32>
    %c0_9 = arith.constant 0 : index
    %c0_10 = arith.constant 0 : index
    %10 = vector.load %arg5[%c0_9, %c0_10] : memref<4x1xf32, #tpu.memory_space<vmem>>, vector<4x1xf32>
    %11 = vector.broadcast %10 : vector<4x1xf32> to vector<4x128xf32>
    %12 = arith.addf %9, %11 : vector<4x128xf32>
    %cst_11 = arith.constant dense<0xFF800000> : vector<128xf32>
    %13 = vector.multi_reduction <maximumf>, %12, %cst_11 [0] : vector<4x128xf32> to vector<128xf32>
    %14 = vector.shape_cast %13 : vector<128xf32> to vector<1x128xf32>
    %15 = vector.broadcast %14 : vector<1x128xf32> to vector<4x128xf32>
    %16 = arith.subf %12, %15 : vector<4x128xf32>
    %17 = math.exp %16 : vector<4x128xf32>
    %cst_12 = arith.constant dense<0.000000e+00> : vector<128xf32>
    %18 = vector.multi_reduction <add>, %17, %cst_12 [0] : vector<4x128xf32> to vector<128xf32>
    %19 = vector.shape_cast %18 : vector<128xf32> to vector<1x128xf32>
    %20 = tpu.reciprocal %19 {approx = true} : vector<1x128xf32> -> vector<1x128xf32>
    %21 = arith.mulf %19, %20 : vector<1x128xf32>
    %cst_13 = arith.constant 2.000000e+00 : f32
    %22 = vector.broadcast %cst_13 : f32 to vector<1x128xf32>
    %23 = arith.subf %22, %21 : vector<1x128xf32>
    %24 = arith.mulf %20, %23 : vector<1x128xf32>
    %25 = vector.broadcast %24 : vector<1x128xf32> to vector<4x128xf32>
    %26 = arith.mulf %17, %25 : vector<4x128xf32>
    %c0_14 = arith.constant 0 : index
    %c0_15 = arith.constant 0 : index
    %27 = vector.load %arg6[%c0_14, %c0_15] : memref<4x128xf32, #tpu.memory_space<vmem>>, vector<4x128xf32>
    tpu.vector_store %arg6[%c0_14, %c0_15], %26 {strides = array<i32>} : memref<4x128xf32, #tpu.memory_space<vmem>>, vector<4x128xf32>,
    return
  }
  func.func @transform_0(%arg0: i32) -> (i32, i32) {
    %c0_i32 = arith.constant 0 : i32
    %c0_i32_0 = arith.constant 0 : i32
    return %c0_i32, %arg0 : i32, i32
  }
  func.func @transform_1(%arg0: i32) -> (i32, i32) {
    %c0_i32 = arith.constant 0 : i32
    %c0_i32_0 = arith.constant 0 : i32
    %c0_i32_1 = arith.constant 0 : i32
    return %c0_i32, %c0_i32_0 : i32, i32
  }
  func.func @transform_2(%arg0: i32) -> (i32, i32) {
    %c0_i32 = arith.constant 0 : i32
    %c0_i32_0 = arith.constant 0 : i32
    %c0_i32_1 = arith.constant 0 : i32
    return %c0_i32, %c0_i32_0 : i32, i32
  }
  func.func @transform_3(%arg0: i32) -> (i32, i32) {
    %c0_i32 = arith.constant 0 : i32
    %c0_i32_0 = arith.constant 0 : i32
    %c0_i32_1 = arith.constant 0 : i32
    return %c0_i32, %c0_i32_0 : i32, i32
  }
  func.func @transform_4(%arg0: i32) -> (i32, i32) {
    %c0_i32 = arith.constant 0 : i32
    %c0_i32_0 = arith.constant 0 : i32
    %c0_i32_1 = arith.constant 0 : i32
    return %c0_i32, %c0_i32_0 : i32, i32
  }
  func.func @transform_5(%arg0: i32) -> (i32, i32) {
    %c0_i32 = arith.constant 0 : i32
    %c0_i32_0 = arith.constant 0 : i32
    return %c0_i32, %arg0 : i32, i32
  }
}

</mosaic_0001>

<bundles_post_ra>
// kernel: tpu_custom_call.1
= control target key start
LH: loop header
LB: loop body
LE: loop exit
PB: predicated region body
PF: predicated region fallthrough
CT: control target
= control target key end

     0   :  { %vm50_vm0 = vcmask 64512   ;;  %v346_v5 = vmov 0   ;;  %s430_s0 = inlined_call_operand.vmem [shape: f32[8,128], index: 0, kind: input, shape index: {}]   ;;  %s431_s1 = inlined_call_operand.vmem [shape: f32[32,8], index: 1, kind: input, shape index: {}]   ;;  %s432_s2 = inlined_call_operand.vmem [shape: f32[32,1], index: 2, kind: input, shape index: {}]   ;;  %s433_s3 = inlined_call_operand.vmem [shape: f32[4,32], index: 3, kind: input, shape index: {}]   ;;  %s434_s4 = inlined_call_operand.vmem [shape: f32[4,1], index: 4, kind: input, shape index: {}]   ;;  %s435_s5 = inlined_call_operand.hbm [shape: f32[4,128], index: 5, kind: output, shape index: {}]  }
   0x1   :  { %v21_v0 = vld [vmem:[%s430_s0] sm:$0xff]  ;;  %v23_v2 = vld [vmem:[%s431_s1 + $0x8] sm:$0xff]  ;;  %v24_v3 = vld [vmem:[%s431_s1 + $0x10] sm:$0xff]  ;;  %316 = vset.pattern.permute.xlu0 %v346_v5 }
   0x2   :  { %v22_v1 = vld [vmem:[%s431_s1] sm:$0xff]  ;;  %286 = vmatprep.subr.mxu0 %v21_v0  ;;  %v28_v6 = vld [vmem:[%s432_s2 + $0x10] sm:$0xff] }
   0x3   :  { %288 = vmatprep.mubr.msk.f32.mxu0 %vm50_vm0, %v22_v1  ;;  %v26_v4 = vld [vmem:[%s432_s2] sm:$0xff]  ;;  %287 = vmatpush3.msra.mxu0 %v21_v0 }
   0x4   :  { %289 = vmatmul.mubr.msk.f32.vlgmr.msra.gmra.mrb[0].mxu0 %vm50_vm0, %v23_v2  ;;  %32 = vperm.xlu0 %316, %v26_v4  }
   0x5   :  { %10 = vsyncpa [#allocation3], 0  ;;  %291 = vmatprep.mubr.msk.f32.mxu0 %vm50_vm0, %v24_v3  ;;  %v25_v7 = vld [vmem:[%s431_s1 + $0x18] sm:$0xff]  ;;  %v27_v8 = vld [vmem:[%s432_s2 + $0x8] sm:$0xff]  ;;  %317 = vset.pattern.permute.xlu1 %v346_v5  ;;  %v347_v11 = vmov 0.0|0.0   ;;  %vm348_vm1 = vmmov 0  }
   0x6   :  { %42 = vperm.xlu1 %317, %v28_v6   ;;  %v29_v9 = vld [vmem:[%s432_s2 + $0x18] sm:$0xff]  ;;  %v153_v10 = vld [vmem:[%s434_s4] sm:$0xf]  ;;  %305 = vmatprep.subr.bf16.mxu1 %v347_v11  ;;  %v349_v12 = vmov 0.0   ;;  %vm159_vm2 = vcmask 261120   ;;  %vm233_vm3 = vcmask 1043456  }
   0x7   :  { %302 = vmatprep.mubr.msk.f32.mxu1 %vm348_vm1, %v349_v12  ;;  %v152_v31 = vld [vmem:[%s433_s3] sm:$0xf]  ;;  %s350_s3 = smov [#allocation2]  }
   0x8   :  { %292 = vmatmul.mubr.msk.f32.gmra.mrb[2].mxu0 %vm50_vm0, %v25_v7  ;;  %37 = vperm.xlu0 %316, %v27_v8   ;;  %s263_s4 = sshll.u32 %s350_s3, 4  ;;  %s264_s4 = int_to_ptr.vmem [resolvable:$true] %s263_s4 }
   0x9   :  { %s322_s12 = scalar_lea.vmem %s264_s4, 64  ;;  %p327_p1 = scmp.lt.s32.totalorder %s264_s4, %s264_s4 }
   0xa   :  { %47 = vperm.xlu1 %317, %v29_v9   ;;  %p323_p0 = scmp.ne.s32.totalorder %s264_s4, %s322_s12  ;;  %p328_p2 = scmp.lt.s32.totalorder %s322_s12, %s322_s12 }
   0xc   :  { %156 = vperm.xlu0 %316, %v153_v10   ;;  %p329_p3 = por %p328_p2, %p327_p1 }
   0xe   :  { %p330_p4 = pnand %p329_p3, %p323_p0 }
  0x83   :  { %v33_v13 = vpop.permute.xlu0 %32 }
  0x85   :  { %v43_v14 = vpop.permute.xlu1 %42 }
  0x87   :  { %v38_v15 = vpop.permute.xlu0 %37 }
  0x89   :  { %v48_v21 = vpop.permute.xlu1 %47 }
  0x8b   :  { %v157_v32 = vpop.permute.xlu0 %156 }
  0xd7   :  { %v290_v16 = vpop.f32.mrb[0].mxu0 }
  0xd8   :  { %v135_v17 = vadd.f32 %v290_v16, %v38_v15  ;;  %v129_v18 = vpop.f32.mrb[1].mxu0 }
  0xd9   :  { %v130_v19 = vadd.f32 %v129_v18, %v33_v13 }
  0xda   :  { %v149_v20 = vmax.f32 %v135_v17, 0.0 }
  0xdb   :  { %v148_v22 = vmax.f32 %v130_v19, 0.0  ;;  %v293_v23 = vpop.f32.mrb[2].mxu0 }
  0xdc   :  { %v145_v24 = vadd.f32 %v293_v23, %v48_v21  ;;  %v139_v25 = vpop.f32.mrb[3].mxu0 }
  0xdd   :  { %v140_v26 = vadd.f32 %v139_v25, %v43_v14  ;;  %v306_v27 = vpack.c.bf16 %v149_v20, %v148_v22 }
  0xde   :  { %v151_v28 = vmax.f32 %v145_v24, 0.0 }
  0xdf   :  { %v150_v29 = vmax.f32 %v140_v26, 0.0  ;;  %307 = vmatpush3.bf16.msra.mxu1 %v306_v27 }
  0xe0   :  { %308 = vmatprep.subr.bf16.mxu1 %v347_v11 }
  0xe1   :  { %v309_v30 = vpack.c.bf16 %v151_v28, %v150_v29 }
  0xe3   :  { %310 = vmatpush3.bf16.msra.mxu1 %v309_v30 }
  0xe6   :  { %303 = vmatmul.mubr.msk.f32.vlgmr.msra.gmra.mrb[0].mxu1 %vm159_vm2, %v152_v31 }
 0x1b9   :  { %v229_v33 = vpop.f32.mrb[0].mxu1 }
 0x1ba   :  { %v230_v34 = vadd.f32 %v229_v33, %v157_v32  ;;  %v304_v35 = vpop.f32.mrb[1].mxu1 }
 0x1bc   :  { %v234_v36 = vsel %vm233_vm3, %v230_v34, -inf }
 0x1bd   :  { %v235_v37 = vrot.slane %v234_v36, 4 }
 0x1bf   :  { %v236_v38 = vmax.f32 %v234_v36, %v235_v37 }
 0x1c1   :  { %v237_v39 = vrot.slane %v236_v38, 2 }
 0x1c3   :  { %v238_v40 = vmax.f32 %v236_v38, %v237_v39 }
 0x1c5   :  { %v239_v41 = vrot.slane %v238_v40, 1 }
 0x1c7   :  { %v240_v42 = vmax.f32 %v238_v40, %v239_v41 }
 0x1c9   :  { %v241_v43 = vsub.f32 %v230_v34, %v240_v42 }
 0x1cb   :  { %v242_v44 = vmul.f32 1.442695, %v241_v43 }
 0x1cd   :  { %318 = vpow2.f32 %v242_v44 }
 0x1d7   :  { %v319_v45 = vpop.eup %318 }
 0x1d8   :  { %v244_v46 = vsel %vm233_vm3, %v319_v45, 0.0 }
 0x1d9   :  { %v245_v47 = vrot.slane %v244_v46, 4 }
 0x1db   :  { %v246_v48 = vadd.f32 %v245_v47, %v244_v46 }
 0x1dd   :  { %v247_v49 = vrot.slane %v246_v48, 2 }
 0x1df   :  { %v248_v50 = vadd.f32 %v247_v49, %v246_v48 }
 0x1e1   :  { %v249_v51 = vrot.slane %v248_v50, 1 }
 0x1e3   :  { %v250_v52 = vadd.f32 %v249_v51, %v248_v50 }
 0x1e5   :  { %320 = vrcp.f32 %v250_v52 }
 0x1ef   :  { %v321_v53 = vpop.eup %320 }
 0x1f0   :  { %v252_v54 = vmul.f32 %v321_v53, %v250_v52 }
 0x1f2   :  { %v253_v55 = vsub.f32 2.0, %v252_v54 }
 0x1f4   :  { %v254_v56 = vmul.f32 %v321_v53, %v253_v55 }
 0x1f6   :  { %v255_v57 = vmul.f32 %v319_v45, %v254_v56 }
 0x1f8   :  { %256 = vst [vmem:[#allocation2] sm:$0xf] %v255_v57 }
 0x1f9   :  { %333 = shalt.err (!%p330_p4)
}
 0x1fa   :  { %s334_s15 = scalar_lea.hbm %s435_s5, 64 }
 0x1fb   :  { %p335_p5 = scmp.ne.s32.totalorder %s435_s5, %s334_s15  ;;  %p338_p6 = scmp.lt.u32.totalorder %s334_s15, %s435_s5 }
 0x1fd   :  { %p340_p7 = pnand %p338_p6, %p335_p5 }
 0x1ff   :  { %343 = shalt.err (!%p340_p7)
}
 0x200   :  { %266 = dma.vmem_to_hbm [thread:$0]  %s264_s4, 64, %s435_s5, [#allocation3]  }
 0x201   :  { %344 = dma.done.wait [#allocation3], 64  }
 0x202   :  { %345 = vsyncadd [#allocation3], 4294967232 }
 0x203   :  { %270 = vsyncpa [#allocation3], 1 }

</bundles_post_ra>
